<compile_context>
chip_gen: v7x
topology: tpu7x:2x2x1
jax: 0.10.0
libtpu: 0.0.40
codegen_flags: <defaults>
</compile_context>

<pallas_src>
import functools

import jax
import jax.numpy as jnp
from jax import lax
from jax.experimental import pallas as pl
from jax.experimental.pallas import tpu as pltpu


# --------------------------------------------------------------------------
# hardware queries (safe fallbacks) & helpers
# --------------------------------------------------------------------------
_NUM_TC_SPLIT = 2   # v7x has 2 TensorCores/chip; an extra serial axis is
                    # harmless on 1-TC parts (v5e/v6e).


def _vmem_capacity_bytes():
    try:
        return int(pltpu.get_tpu_info().vmem_capacity_bytes)
    except Exception:
        return 64 << 20          # conservative (v7x per-TC VMEM)


def _round_up(x, m):
    return ((x + m - 1) // m) * m


# --------------------------------------------------------------------------
# geometric ("colinearity") loss, lane-dense points (2K, B), O(B) collapse
# --------------------------------------------------------------------------
def _geo_loss(pts, *, K, B, gamma_h, gamma_v):
    """pts: (2K, B) f32, row c*K + k = coordinate c of keypoint k.

    Equal (up to f32 reassociation) to the PyTorch
        gamma_h * (hA + hB).mean() / 2 + gamma_v * (vA+vB+vC+vD).mean() / 4
    using mean_{i,j}(1 - a_i.b_j) = 1 - (sum_i a_i).(sum_j b_j) / B^2.
    """
    eps = 1e-12  # torch.nn.functional.normalize default
    # segments: v53 v31 v10 v64 v42 v20 h21 h43 h65
    segs = ((5, 3), (3, 1), (1, 0), (6, 4), (4, 2), (2, 0),
            (2, 1), (4, 3), (6, 5))
    vx = jnp.concatenate(
        [pts[i:i + 1, :] - pts[j:j + 1, :] for i, j in segs], axis=0)          # (9, B)
    vy = jnp.concatenate(
        [pts[K + i:K + i + 1, :] - pts[K + j:K + j + 1, :] for i, j in segs], axis=0)
    inv = lax.rsqrt(jnp.maximum(vx * vx + vy * vy, eps * eps))                 # EUP
    sx = jnp.sum(vx * inv, axis=1, keepdims=True)                              # (9, 1)
    sy = jnp.sum(vy * inv, axis=1, keepdims=True)                              # 2 lane reductions

    def dot(a, b):                               # sum_{i,j} a_i . b_j
        return sx[a, 0] * sx[b, 0] + sy[a, 0] * sy[b, 0]

    # vA=(v31,v53) vB=(v10,v31) vC=(v64,v42) vD=(v42,v20) hA=(h43,h21) hB=(h65,h43)
    s_v = dot(1, 0) + dot(2, 1) + dot(3, 4) + dot(4, 5)
    s_h = dot(7, 6) + dot(8, 7)
    c_h = gamma_h / (2.0 * B * B)
    c_v = gamma_v / (4.0 * B * B)
    return (gamma_h + gamma_v) - c_h * s_h - c_v * s_v


# --------------------------------------------------------------------------
# kernel 1: softargmax / l1 losses — heatmaps never touched (no dead DMA)
# --------------------------------------------------------------------------
def _points_loss_kernel(pts_ref, tpts_ref, out_ref, *,
                        loss_type, include_geo, gamma_h, gamma_v, K, B):
    pts = pts_ref[...].astype(jnp.float32)       # (2K, B)
    tpts = tpts_ref[...].astype(jnp.float32)     # (2K, B)
    d = pts - tpts

    if loss_type in ('l2_softargmax', 'l2_sm'):
        loc = jnp.sum(d * d) * (1.0 / B)
    else:  # 'l1_softargmax' / 'l1_sm'
        loc = jnp.sum(jnp.abs(d)) * (1.0 / B)

    if include_geo:
        geo = _geo_loss(pts, K=K, B=B, gamma_h=gamma_h, gamma_v=gamma_v)
    else:
        # TODO(synk): torch returns torch.tensor(0) (int); emitted as f32 0.0.
        geo = jnp.zeros((), jnp.float32)

    out_ref[0, 0] = loc
    out_ref[0, 1] = geo
    out_ref[0, 2] = loc + geo


# --------------------------------------------------------------------------
# kernel 2: l2_heatmap partial sums — lane-dense (rows, Cp) tiles,
# (parallel core, arbitrary step) grid, (8, Cp) f32 output-block accumulator
# --------------------------------------------------------------------------
def _heatmap_partial_kernel(hm_ref, thm_ref, part_ref):
    step = pl.program_id(1)

    @pl.when(step == 0)
    def _():
        part_ref[...] = jnp.zeros_like(part_ref)

    d = hm_ref[...].astype(jnp.float32) - thm_ref[...].astype(jnp.float32)
    sq = d * d                                          # (tile_rows, Cp)
    g = sq.shape[0] // 8                                # tile_rows is a multiple of 8
    # layout-preserving sublane-split reshape; reduce leading dim with VPU adds
    part_ref[...] += jnp.sum(sq.reshape(g, 8, sq.shape[1]), axis=0)


# --------------------------------------------------------------------------
# kernel 3: finalize — reduce per-core partials (+ geo) to the (1,3) SMEM out
# --------------------------------------------------------------------------
def _finalize_geo_kernel(part_ref, pts_ref, out_ref, *,
                         inv_b, gamma_h, gamma_v, K, B):
    loc = jnp.sum(part_ref[...]) * inv_b
    geo = _geo_loss(pts_ref[...].astype(jnp.float32),
                    K=K, B=B, gamma_h=gamma_h, gamma_v=gamma_v)
    out_ref[0, 0] = loc
    out_ref[0, 1] = geo
    out_ref[0, 2] = loc + geo


def _finalize_nogeo_kernel(part_ref, out_ref, *, inv_b):
    loc = jnp.sum(part_ref[...]) * inv_b
    out_ref[0, 0] = loc
    # TODO(synk): torch returns torch.tensor(0) (int); emitted as f32 0.0.
    out_ref[0, 1] = jnp.zeros((), jnp.float32)
    out_ref[0, 2] = loc


# --------------------------------------------------------------------------
# wrapper
# --------------------------------------------------------------------------
def cross_ratio_loss(heatmap, points, target_hm, target_points, *,
                     loss_type='l2_softargmax', include_geo=True,
                     geo_loss_gamma_horz=0.05, geo_loss_gamma_vert=0.05):
    B, K, _ = points.shape
    gh = float(geo_loss_gamma_horz)
    gv = float(geo_loss_gamma_vert)

    out_shape = jax.ShapeDtypeStruct((1, 3), jnp.float32)
    smem_out = pl.BlockSpec(memory_space=pltpu.MemorySpace.SMEM)
    vmem_full = pl.BlockSpec(memory_space=pltpu.MemorySpace.VMEM)

    def _points_lane_dense(p):
        # (B, K, 2) -> (2K, B): batch on the 128-lane axis; row c*K + k = coord c of kpt k
        return jnp.transpose(p.astype(jnp.float32), (2, 1, 0)).reshape(2 * K, B)

    if loss_type in ('l2_heatmap', 'l2_hm'):
        Bh, Kh, H, W = heatmap.shape
        R, C = Bh * Kh, H * W
        Cp = _round_up(C, 128)                       # lane-dense minor dim
        num_cores = _NUM_TC_SPLIT

        # generation-aware VMEM budget (exact now: tiles are lane-dense)
        cap = _vmem_capacity_bytes()
        budget = min(32 << 20, max(8 << 20, cap // 4))
        itemsz = heatmap.dtype.itemsize + target_hm.dtype.itemsize
        per_row = Cp * itemsz * 2                    # two inputs, double-buffered
        tile_rows = max(8, min((budget // per_row) // 8 * 8,
                               _round_up(pl.cdiv(R, num_cores), 8)))
        steps = pl.cdiv(R, num_cores * tile_rows)
        Rp = num_cores * steps * tile_rows

        hm2 = heatmap.reshape(R, C)
        thm2 = target_hm.reshape(R, C)
        if (Rp, Cp) != (R, C):
            # zero padding is exact for a sum of squared differences
            hm2 = jnp.pad(hm2, ((0, Rp - R), (0, Cp - C)))
            thm2 = jnp.pad(thm2, ((0, Rp - R), (0, Cp - C)))

        vmem_needed = tile_rows * per_row + 4 * (8 * Cp * 4) + (2 << 20)
        vmem_limit = int(min(cap, max(vmem_needed, 16 << 20)))

        partial = pl.pallas_call(
            _heatmap_partial_kernel,
            out_shape=jax.ShapeDtypeStruct((num_cores * 8, Cp), jnp.float32),
            grid_spec=pltpu.PrefetchScalarGridSpec(
                num_scalar_prefetch=0,
                grid=(num_cores, steps),
                in_specs=[
                    pl.BlockSpec((tile_rows, Cp), lambda c, s: (c * steps + s, 0)),
                    pl.BlockSpec((tile_rows, Cp), lambda c, s: (c * steps + s, 0)),
                ],
                out_specs=pl.BlockSpec((8, Cp), lambda c, s: (c, 0)),
            ),
            compiler_params=pltpu.CompilerParams(
                dimension_semantics=("parallel", "arbitrary"),
                vmem_limit_bytes=vmem_limit),
            cost_estimate=pl.CostEstimate(
                flops=3 * int(Rp) * int(Cp),
                transcendentals=0,
                bytes_accessed=int(Rp * Cp * itemsz + num_cores * 8 * Cp * 4)),
        )(hm2, thm2)

        inv_b = 1.0 / float(Bh)   # torch .mean() is over the heatmap batch dim

        if include_geo:
            pts_t = _points_lane_dense(points)
            fin = functools.partial(_finalize_geo_kernel, inv_b=inv_b,
                                    gamma_h=gh, gamma_v=gv, K=K, B=B)
            out = pl.pallas_call(
                fin, out_shape=out_shape,
                in_specs=[vmem_full, vmem_full],
                out_specs=smem_out,
            )(partial, pts_t)
        else:
            fin = functools.partial(_finalize_nogeo_kernel, inv_b=inv_b)
            out = pl.pallas_call(
                fin, out_shape=out_shape,
                in_specs=[vmem_full],
                out_specs=smem_out,
            )(partial)

    elif loss_type in ('l2_softargmax', 'l2_sm', 'l1_softargmax', 'l1_sm'):
        pts_t = _points_lane_dense(points)
        tpts_t = _points_lane_dense(target_points)
        kernel = functools.partial(
            _points_loss_kernel, loss_type=loss_type, include_geo=include_geo,
            gamma_h=gh, gamma_v=gv, K=K, B=B)
        out = pl.pallas_call(
            kernel,
            out_shape=out_shape,
            in_specs=[vmem_full, vmem_full],
            out_specs=smem_out,
            cost_estimate=pl.CostEstimate(
                flops=60 * int(B) * int(K),
                transcendentals=9 * int(B),
                bytes_accessed=int(2 * 2 * K * B * 4 + 12)),
        )(pts_t, tpts_t)
    else:
        raise ValueError(f'Did not recognize loss function selection: {loss_type}')

    return out[0, 0], out[0, 1], out[0, 2]


# --------------------------------------------------------------------------
# pure-JAX reference (original O(B^2) formulation, for sanity check)
# --------------------------------------------------------------------------
def _reference(heatmap, points, target_hm, target_points,
               loss_type, include_geo, gh, gv):
    if loss_type in ('l2_softargmax', 'l2_sm'):
        loc = jnp.mean(jnp.sum(jnp.sum((points - target_points) ** 2, axis=2), axis=1))
    elif loss_type in ('l2_heatmap', 'l2_hm'):
        loc = jnp.mean(jnp.sum((heatmap - target_hm) ** 2, axis=(1, 2, 3)))
    else:
        loc = jnp.mean(jnp.sum(jnp.sum(jnp.abs(points - target_points), axis=2), axis=1))

    if include_geo:
        nrm = lambda v: v / jnp.maximum(jnp.linalg.norm(v, axis=1, keepdims=True), 1e-12)
        p = lambda i: points[:, i]
        td = lambda a, b: jnp.tensordot(a, b, axes=([1], [1]))
        v53, v31, v10 = nrm(p(5) - p(3)), nrm(p(3) - p(1)), nrm(p(1) - p(0))
        v64, v42, v20 = nrm(p(6) - p(4)), nrm(p(4) - p(2)), nrm(p(2) - p(0))
        h21, h43, h65 = nrm(p(2) - p(1)), nrm(p(4) - p(3)), nrm(p(6) - p(5))
        vA, vB = 1.0 - td(v31, v53), 1.0 - td(v10, v31)
        vC, vD = 1.0 - td(v64, v42), 1.0 - td(v42, v20)
        hA, hB = 1.0 - td(h43, h21), 1.0 - td(h65, h43)
        geo = gh * jnp.mean(hA + hB) / 2 + gv * jnp.mean(vA + vB + vC + vD) / 4
    else:
        geo = jnp.float32(0.0)
    return loc, geo, loc + geo


if __name__ == "__main__":
    B, K, H, W = 2, 7, 16, 16
    key = jax.random.PRNGKey(0)
    k1, k2, k3, k4 = jax.random.split(key, 4)
    heatmap = jax.random.uniform(k1, (B, K, H, W), jnp.float32)
    target_hm = jax.random.uniform(k2, (B, K, H, W), jnp.float32)
    points = jax.random.uniform(k3, (B, K, 2), jnp.float32)
    target_points = jax.random.uniform(k4, (B, K, 2), jnp.float32)

    gh, gv = 0.05, 0.05
    cases = [('l2_softargmax', True),
             ('l1_softargmax', True),
             ('l2_heatmap', True),
             ('l2_heatmap', False),
             ('l2_softargmax', False)]

    for loss_type, include_geo in cases:
        loc, geo, tot = cross_ratio_loss(
            heatmap, points, target_hm, target_points,
            loss_type=loss_type, include_geo=include_geo,
            geo_loss_gamma_horz=gh, geo_loss_gamma_vert=gv)
        jax.block_until_ready((loc, geo, tot))

        rloc, rgeo, rtot = _reference(heatmap, points, target_hm, target_points,
                                      loss_type, include_geo, gh, gv)
        assert jnp.allclose(loc, rloc, atol=1e-5, rtol=1e-5), (loss_type, loc, rloc)
        assert jnp.allclose(geo, rgeo, atol=1e-5, rtol=1e-5), (loss_type, geo, rgeo)
        assert jnp.allclose(tot, rtot, atol=1e-5, rtol=1e-5), (loss_type, tot, rtot)

    print("KERNEL_OK")
</pallas_src>

<mosaic_0001>
module attributes {stable_mosaic.version = 11 : i64} {
  func.func @_points_loss_kernel(%arg0: memref<14x2xf32, #tpu.memory_space<vmem>>, %arg1: memref<14x2xf32, #tpu.memory_space<vmem>>, %arg2: memref<1x3xf32, #tpu.memory_space<smem>>) attributes {dimension_semantics = [], scalar_prefetch = 0 : i64, scratch_operands = 0 : i64, tpu.core_type = #tpu.core_type<tc>} {
    %c0 = arith.constant 0 : index
    %c0_0 = arith.constant 0 : index
    %0 = vector.load %arg0[%c0, %c0_0] : memref<14x2xf32, #tpu.memory_space<vmem>>, vector<14x2xf32>
    %c0_1 = arith.constant 0 : index
    %c0_2 = arith.constant 0 : index
    %1 = vector.load %arg1[%c0_1, %c0_2] : memref<14x2xf32, #tpu.memory_space<vmem>>, vector<14x2xf32>
    %2 = arith.subf %0, %1 : vector<14x2xf32>
    %3 = arith.mulf %2, %2 : vector<14x2xf32>
    %4 = vector.shape_cast %3 : vector<14x2xf32> to vector<1x14x2xf32>
    %cst = arith.constant dense<0.000000e+00> : vector<1xf32>
    %5 = vector.multi_reduction <add>, %4, %cst [1, 2] : vector<1x14x2xf32> to vector<1xf32>
    %6 = vector.shape_cast %5 : vector<1xf32> to vector<1x1x1xf32>
    %7 = vector.extract %6[0, 0, 0] : f32 from vector<1x1x1xf32>
    %cst_3 = arith.constant 5.000000e-01 : f32
    %8 = arith.mulf %7, %cst_3 : f32
    %9 = vector.extract_strided_slice %0 {offsets = [5, 0], sizes = [1, 2], strides = [1, 1]} : vector<14x2xf32> to vector<1x2xf32>
    %10 = vector.extract_strided_slice %0 {offsets = [3, 0], sizes = [1, 2], strides = [1, 1]} : vector<14x2xf32> to vector<1x2xf32>
    %11 = arith.subf %9, %10 : vector<1x2xf32>
    %12 = vector.extract_strided_slice %0 {offsets = [3, 0], sizes = [1, 2], strides = [1, 1]} : vector<14x2xf32> to vector<1x2xf32>
    %13 = vector.extract_strided_slice %0 {offsets = [1, 0], sizes = [1, 2], strides = [1, 1]} : vector<14x2xf32> to vector<1x2xf32>
    %14 = arith.subf %12, %13 : vector<1x2xf32>
    %15 = vector.extract_strided_slice %0 {offsets = [1, 0], sizes = [1, 2], strides = [1, 1]} : vector<14x2xf32> to vector<1x2xf32>
    %16 = vector.extract_strided_slice %0 {offsets = [0, 0], sizes = [1, 2], strides = [1, 1]} : vector<14x2xf32> to vector<1x2xf32>
    %17 = arith.subf %15, %16 : vector<1x2xf32>
    %18 = vector.extract_strided_slice %0 {offsets = [6, 0], sizes = [1, 2], strides = [1, 1]} : vector<14x2xf32> to vector<1x2xf32>
    %19 = vector.extract_strided_slice %0 {offsets = [4, 0], sizes = [1, 2], strides = [1, 1]} : vector<14x2xf32> to vector<1x2xf32>
    %20 = arith.subf %18, %19 : vector<1x2xf32>
    %21 = vector.extract_strided_slice %0 {offsets = [4, 0], sizes = [1, 2], strides = [1, 1]} : vector<14x2xf32> to vector<1x2xf32>
    %22 = vector.extract_strided_slice %0 {offsets = [2, 0], sizes = [1, 2], strides = [1, 1]} : vector<14x2xf32> to vector<1x2xf32>
    %23 = arith.subf %21, %22 : vector<1x2xf32>
    %24 = vector.extract_strided_slice %0 {offsets = [2, 0], sizes = [1, 2], strides = [1, 1]} : vector<14x2xf32> to vector<1x2xf32>
    %25 = vector.extract_strided_slice %0 {offsets = [0, 0], sizes = [1, 2], strides = [1, 1]} : vector<14x2xf32> to vector<1x2xf32>
    %26 = arith.subf %24, %25 : vector<1x2xf32>
    %27 = vector.extract_strided_slice %0 {offsets = [2, 0], sizes = [1, 2], strides = [1, 1]} : vector<14x2xf32> to vector<1x2xf32>
    %28 = vector.extract_strided_slice %0 {offsets = [1, 0], sizes = [1, 2], strides = [1, 1]} : vector<14x2xf32> to vector<1x2xf32>
    %29 = arith.subf %27, %28 : vector<1x2xf32>
    %30 = vector.extract_strided_slice %0 {offsets = [4, 0], sizes = [1, 2], strides = [1, 1]} : vector<14x2xf32> to vector<1x2xf32>
    %31 = vector.extract_strided_slice %0 {offsets = [3, 0], sizes = [1, 2], strides = [1, 1]} : vector<14x2xf32> to vector<1x2xf32>
    %32 = arith.subf %30, %31 : vector<1x2xf32>
    %33 = vector.extract_strided_slice %0 {offsets = [6, 0], sizes = [1, 2], strides = [1, 1]} : vector<14x2xf32> to vector<1x2xf32>
    %34 = vector.extract_strided_slice %0 {offsets = [5, 0], sizes = [1, 2], strides = [1, 1]} : vector<14x2xf32> to vector<1x2xf32>
    %35 = arith.subf %33, %34 : vector<1x2xf32>
    %36 = tpu.concatenate %11, %14, %17, %20, %23, %26, %29, %32, %35 in 0 : vector<1x2xf32>, vector<1x2xf32>, vector<1x2xf32>, vector<1x2xf32>, vector<1x2xf32>, vector<1x2xf32>, vector<1x2xf32>, vector<1x2xf32>, vector<1x2xf32> -> vector<9x2xf32>
    %37 = vector.extract_strided_slice %0 {offsets = [12, 0], sizes = [1, 2], strides = [1, 1]} : vector<14x2xf32> to vector<1x2xf32>
    %38 = vector.extract_strided_slice %0 {offsets = [10, 0], sizes = [1, 2], strides = [1, 1]} : vector<14x2xf32> to vector<1x2xf32>
    %39 = arith.subf %37, %38 : vector<1x2xf32>
    %40 = vector.extract_strided_slice %0 {offsets = [10, 0], sizes = [1, 2], strides = [1, 1]} : vector<14x2xf32> to vector<1x2xf32>
    %41 = vector.extract_strided_slice %0 {offsets = [8, 0], sizes = [1, 2], strides = [1, 1]} : vector<14x2xf32> to vector<1x2xf32>
    %42 = arith.subf %40, %41 : vector<1x2xf32>
    %43 = vector.extract_strided_slice %0 {offsets = [8, 0], sizes = [1, 2], strides = [1, 1]} : vector<14x2xf32> to vector<1x2xf32>
    %44 = vector.extract_strided_slice %0 {offsets = [7, 0], sizes = [1, 2], strides = [1, 1]} : vector<14x2xf32> to vector<1x2xf32>
    %45 = arith.subf %43, %44 : vector<1x2xf32>
    %46 = vector.extract_strided_slice %0 {offsets = [13, 0], sizes = [1, 2], strides = [1, 1]} : vector<14x2xf32> to vector<1x2xf32>
    %47 = vector.extract_strided_slice %0 {offsets = [11, 0], sizes = [1, 2], strides = [1, 1]} : vector<14x2xf32> to vector<1x2xf32>
    %48 = arith.subf %46, %47 : vector<1x2xf32>
    %49 = vector.extract_strided_slice %0 {offsets = [11, 0], sizes = [1, 2], strides = [1, 1]} : vector<14x2xf32> to vector<1x2xf32>
    %50 = vector.extract_strided_slice %0 {offsets = [9, 0], sizes = [1, 2], strides = [1, 1]} : vector<14x2xf32> to vector<1x2xf32>
    %51 = arith.subf %49, %50 : vector<1x2xf32>
    %52 = vector.extract_strided_slice %0 {offsets = [9, 0], sizes = [1, 2], strides = [1, 1]} : vector<14x2xf32> to vector<1x2xf32>
    %53 = vector.extract_strided_slice %0 {offsets = [7, 0], sizes = [1, 2], strides = [1, 1]} : vector<14x2xf32> to vector<1x2xf32>
    %54 = arith.subf %52, %53 : vector<1x2xf32>
    %55 = vector.extract_strided_slice %0 {offsets = [9, 0], sizes = [1, 2], strides = [1, 1]} : vector<14x2xf32> to vector<1x2xf32>
    %56 = vector.extract_strided_slice %0 {offsets = [8, 0], sizes = [1, 2], strides = [1, 1]} : vector<14x2xf32> to vector<1x2xf32>
    %57 = arith.subf %55, %56 : vector<1x2xf32>
    %58 = vector.extract_strided_slice %0 {offsets = [11, 0], sizes = [1, 2], strides = [1, 1]} : vector<14x2xf32> to vector<1x2xf32>
    %59 = vector.extract_strided_slice %0 {offsets = [10, 0], sizes = [1, 2], strides = [1, 1]} : vector<14x2xf32> to vector<1x2xf32>
    %60 = arith.subf %58, %59 : vector<1x2xf32>
    %61 = vector.extract_strided_slice %0 {offsets = [13, 0], sizes = [1, 2], strides = [1, 1]} : vector<14x2xf32> to vector<1x2xf32>
    %62 = vector.extract_strided_slice %0 {offsets = [12, 0], sizes = [1, 2], strides = [1, 1]} : vector<14x2xf32> to vector<1x2xf32>
    %63 = arith.subf %61, %62 : vector<1x2xf32>
    %64 = tpu.concatenate %39, %42, %45, %48, %51, %54, %57, %60, %63 in 0 : vector<1x2xf32>, vector<1x2xf32>, vector<1x2xf32>, vector<1x2xf32>, vector<1x2xf32>, vector<1x2xf32>, vector<1x2xf32>, vector<1x2xf32>, vector<1x2xf32> -> vector<9x2xf32>
    %65 = arith.mulf %36, %36 : vector<9x2xf32>
    %66 = arith.mulf %64, %64 : vector<9x2xf32>
    %67 = arith.addf %65, %66 : vector<9x2xf32>
    %cst_4 = arith.constant 1.000000e-24 : f32
    %68 = vector.broadcast %cst_4 : f32 to vector<9x2xf32>
    %69 = arith.maximumf %67, %68 : vector<9x2xf32>
    %70 = math.rsqrt %69 : vector<9x2xf32>
    %71 = arith.mulf %36, %70 : vector<9x2xf32>
    %cst_5 = arith.constant dense<0.000000e+00> : vector<9xf32>
    %72 = vector.multi_reduction <add>, %71, %cst_5 [1] : vector<9x2xf32> to vector<9xf32>
    %73 = vector.shape_cast %72 : vector<9xf32> to vector<9x1xf32>
    %74 = arith.mulf %64, %70 : vector<9x2xf32>
    %cst_6 = arith.constant dense<0.000000e+00> : vector<9xf32>
    %75 = vector.multi_reduction <add>, %74, %cst_6 [1] : vector<9x2xf32> to vector<9xf32>
    %76 = vector.shape_cast %75 : vector<9xf32> to vector<9x1xf32>
    %77 = vector.extract_strided_slice %73 {offsets = [1, 0], sizes = [1, 1], strides = [1, 1]} : vector<9x1xf32> to vector<1x1xf32>
    %78 = vector.extract %77[0, 0] : f32 from vector<1x1xf32>
    %79 = vector.extract_strided_slice %73 {offsets = [0, 0], sizes = [1, 1], strides = [1, 1]} : vector<9x1xf32> to vector<1x1xf32>
    %80 = vector.extract %79[0, 0] : f32 from vector<1x1xf32>
    %81 = arith.mulf %78, %80 : f32
    %82 = vector.extract_strided_slice %76 {offsets = [1, 0], sizes = [1, 1], strides = [1, 1]} : vector<9x1xf32> to vector<1x1xf32>
    %83 = vector.extract %82[0, 0] : f32 from vector<1x1xf32>
    %84 = vector.extract_strided_slice %76 {offsets = [0, 0], sizes = [1, 1], strides = [1, 1]} : vector<9x1xf32> to vector<1x1xf32>
    %85 = vector.extract %84[0, 0] : f32 from vector<1x1xf32>
    %86 = arith.mulf %83, %85 : f32
    %87 = arith.addf %81, %86 : f32
    %88 = vector.extract_strided_slice %73 {offsets = [2, 0], sizes = [1, 1], strides = [1, 1]} : vector<9x1xf32> to vector<1x1xf32>
    %89 = vector.extract %88[0, 0] : f32 from vector<1x1xf32>
    %90 = vector.extract_strided_slice %73 {offsets = [1, 0], sizes = [1, 1], strides = [1, 1]} : vector<9x1xf32> to vector<1x1xf32>
    %91 = vector.extract %90[0, 0] : f32 from vector<1x1xf32>
    %92 = arith.mulf %89, %91 : f32
    %93 = vector.extract_strided_slice %76 {offsets = [2, 0], sizes = [1, 1], strides = [1, 1]} : vector<9x1xf32> to vector<1x1xf32>
    %94 = vector.extract %93[0, 0] : f32 from vector<1x1xf32>
    %95 = vector.extract_strided_slice %76 {offsets = [1, 0], sizes = [1, 1], strides = [1, 1]} : vector<9x1xf32> to vector<1x1xf32>
    %96 = vector.extract %95[0, 0] : f32 from vector<1x1xf32>
    %97 = arith.mulf %94, %96 : f32
    %98 = arith.addf %92, %97 : f32
    %99 = arith.addf %87, %98 : f32
    %100 = vector.extract_strided_slice %73 {offsets = [3, 0], sizes = [1, 1], strides = [1, 1]} : vector<9x1xf32> to vector<1x1xf32>
    %101 = vector.extract %100[0, 0] : f32 from vector<1x1xf32>
    %102 = vector.extract_strided_slice %73 {offsets = [4, 0], sizes = [1, 1], strides = [1, 1]} : vector<9x1xf32> to vector<1x1xf32>
    %103 = vector.extract %102[0, 0] : f32 from vector<1x1xf32>
    %104 = arith.mulf %101, %103 : f32
    %105 = vector.extract_strided_slice %76 {offsets = [3, 0], sizes = [1, 1], strides = [1, 1]} : vector<9x1xf32> to vector<1x1xf32>
    %106 = vector.extract %105[0, 0] : f32 from vector<1x1xf32>
    %107 = vector.extract_strided_slice %76 {offsets = [4, 0], sizes = [1, 1], strides = [1, 1]} : vector<9x1xf32> to vector<1x1xf32>
    %108 = vector.extract %107[0, 0] : f32 from vector<1x1xf32>
    %109 = arith.mulf %106, %108 : f32
    %110 = arith.addf %104, %109 : f32
    %111 = arith.addf %99, %110 : f32
    %112 = vector.extract_strided_slice %73 {offsets = [4, 0], sizes = [1, 1], strides = [1, 1]} : vector<9x1xf32> to vector<1x1xf32>
    %113 = vector.extract %112[0, 0] : f32 from vector<1x1xf32>
    %114 = vector.extract_strided_slice %73 {offsets = [5, 0], sizes = [1, 1], strides = [1, 1]} : vector<9x1xf32> to vector<1x1xf32>
    %115 = vector.extract %114[0, 0] : f32 from vector<1x1xf32>
    %116 = arith.mulf %113, %115 : f32
    %117 = vector.extract_strided_slice %76 {offsets = [4, 0], sizes = [1, 1], strides = [1, 1]} : vector<9x1xf32> to vector<1x1xf32>
    %118 = vector.extract %117[0, 0] : f32 from vector<1x1xf32>
    %119 = vector.extract_strided_slice %76 {offsets = [5, 0], sizes = [1, 1], strides = [1, 1]} : vector<9x1xf32> to vector<1x1xf32>
    %120 = vector.extract %119[0, 0] : f32 from vector<1x1xf32>
    %121 = arith.mulf %118, %120 : f32
    %122 = arith.addf %116, %121 : f32
    %123 = arith.addf %111, %122 : f32
    %124 = vector.extract_strided_slice %73 {offsets = [7, 0], sizes = [1, 1], strides = [1, 1]} : vector<9x1xf32> to vector<1x1xf32>
    %125 = vector.extract %124[0, 0] : f32 from vector<1x1xf32>
    %126 = vector.extract_strided_slice %73 {offsets = [6, 0], sizes = [1, 1], strides = [1, 1]} : vector<9x1xf32> to vector<1x1xf32>
    %127 = vector.extract %126[0, 0] : f32 from vector<1x1xf32>
    %128 = arith.mulf %125, %127 : f32
    %129 = vector.extract_strided_slice %76 {offsets = [7, 0], sizes = [1, 1], strides = [1, 1]} : vector<9x1xf32> to vector<1x1xf32>
    %130 = vector.extract %129[0, 0] : f32 from vector<1x1xf32>
    %131 = vector.extract_strided_slice %76 {offsets = [6, 0], sizes = [1, 1], strides = [1, 1]} : vector<9x1xf32> to vector<1x1xf32>
    %132 = vector.extract %131[0, 0] : f32 from vector<1x1xf32>
    %133 = arith.mulf %130, %132 : f32
    %134 = arith.addf %128, %133 : f32
    %135 = vector.extract_strided_slice %73 {offsets = [8, 0], sizes = [1, 1], strides = [1, 1]} : vector<9x1xf32> to vector<1x1xf32>
    %136 = vector.extract %135[0, 0] : f32 from vector<1x1xf32>
    %137 = vector.extract_strided_slice %73 {offsets = [7, 0], sizes = [1, 1], strides = [1, 1]} : vector<9x1xf32> to vector<1x1xf32>
    %138 = vector.extract %137[0, 0] : f32 from vector<1x1xf32>
    %139 = arith.mulf %136, %138 : f32
    %140 = vector.extract_strided_slice %76 {offsets = [8, 0], sizes = [1, 1], strides = [1, 1]} : vector<9x1xf32> to vector<1x1xf32>
    %141 = vector.extract %140[0, 0] : f32 from vector<1x1xf32>
    %142 = vector.extract_strided_slice %76 {offsets = [7, 0], sizes = [1, 1], strides = [1, 1]} : vector<9x1xf32> to vector<1x1xf32>
    %143 = vector.extract %142[0, 0] : f32 from vector<1x1xf32>
    %144 = arith.mulf %141, %143 : f32
    %145 = arith.addf %139, %144 : f32
    %146 = arith.addf %134, %145 : f32
    %cst_7 = arith.constant 6.250000e-03 : f32
    %147 = arith.mulf %cst_7, %146 : f32
    %cst_8 = arith.constant 1.000000e-01 : f32
    %148 = arith.subf %cst_8, %147 : f32
    %cst_9 = arith.constant 3.125000e-03 : f32
    %149 = arith.mulf %cst_9, %123 : f32
    %150 = arith.subf %148, %149 : f32
    %c0_10 = arith.constant 0 : index
    %c0_11 = arith.constant 0 : index
    %151 = memref.load %arg2[%c0_10, %c0_11] : memref<1x3xf32, #tpu.memory_space<smem>>
    memref.store %8, %arg2[%c0_10, %c0_11] : memref<1x3xf32, #tpu.memory_space<smem>>
    %c0_12 = arith.constant 0 : index
    %c1 = arith.constant 1 : index
    %152 = memref.load %arg2[%c0_12, %c1] : memref<1x3xf32, #tpu.memory_space<smem>>
    memref.store %150, %arg2[%c0_12, %c1] : memref<1x3xf32, #tpu.memory_space<smem>>
    %153 = arith.addf %8, %150 : f32
    %c0_13 = arith.constant 0 : index
    %c2 = arith.constant 2 : index
    %154 = memref.load %arg2[%c0_13, %c2] : memref<1x3xf32, #tpu.memory_space<smem>>
    memref.store %153, %arg2[%c0_13, %c2] : memref<1x3xf32, #tpu.memory_space<smem>>
    return
  }
}

</mosaic_0001>

<bundles_post_ra>
// kernel: tpu_custom_call.1
= control target key start
LH: loop header
LB: loop body
LE: loop exit
PB: predicated region body
PF: predicated region fallthrough
CT: control target
= control target key end

     0   :  { %vm20_vm0 = vcmask 15360   ;;  %s334_s0 = inlined_call_operand.vmem [shape: f32[14,2], index: 0, kind: input, shape index: {}]   ;;  %s335_s1 = inlined_call_operand.vmem [shape: f32[14,2], index: 1, kind: input, shape index: {}]   ;;  %s336_s2 = inlined_call_operand.hbm [shape: f32[1,3], index: 2, kind: output, shape index: {}]  }
   0x1   :  { %v12_v0 = vld [vmem:[%s334_s0] sm:$0xff]  ;;  %v13_v2 = vld [vmem:[%s334_s0 + $0x8] sm:$0x3f] }
   0x2   :  { %v14_v1 = vld [vmem:[%s335_s1] sm:$0xff]  ;;  %v15_v3 = vld [vmem:[%s335_s1 + $0x8] sm:$0x3f]  ;;  %v39_v5 = vrot.slane %v12_v0, 7  ;;  %v36_v6 = vrot.slane %v12_v0, 6 }
   0x3   :  { %v16_v4 = vsub.f32 %v12_v0, %v14_v1  ;;  %v17_v7 = vsub.f32 %v13_v2, %v15_v3 }
   0x4   :  { %7 = vsyncpa [#allocation3], 0  ;;  %vm22_vm1 = vcmask 13312   ;;  %v41_v9 = vsub.f32 %v12_v0, %v39_v5  ;;  %v38_v10 = vsub.f32 %v12_v0, %v36_v6  ;;  %vm58_vm2 = vcmask 1040384  }
   0x5   :  { %v18_v8 = vmul.f32 %v16_v4, %v16_v4  ;;  %v19_v11 = vmul.f32 %v17_v7, %v17_v7  ;;  %vm60_vm3 = vcmask 1041408   ;;  %vm62_vm4 = vcmask 1042432  }
   0x6   :  { %v43_v13 = vrot.slane %v38_v10, 5  ;;  %v45_v14 = vrot.slane %v38_v10, 2  ;;  %v48_v15 = vrot.slane %v41_v9, 7  ;;  %v76_v17 = vsub.f32 %v13_v2, %v39_v5 }
   0x7   :  { %v21_v12 = vsel %vm20_vm0, %v18_v8, 0.0  ;;  %v23_v16 = vsel %vm22_vm1, %v19_v11, 0.0  ;;  %v50_v18 = vrot.slane %v38_v10, 3  ;;  %vm64_vm5 = vcmask 1043456  }
   0x8   :  { %v24_v19 = vadd.f32 %v23_v16, %v21_v12  ;;  %v59_v20 = vsel %vm58_vm2, %v43_v13, %v45_v14  ;;  %vm66_vm6 = vcmask 1044480   ;;  %v73_v21 = vrot.slane %v13_v2, 6 }
   0x9   :  { %v52_v22 = vrot.slane %v41_v9, 4  ;;  %v61_v23 = vsel %vm60_vm3, %v59_v20, %v48_v15  ;;  %vm68_vm7 = vcmask 1045504   ;;  %v78_v24 = vrot.slane %v13_v2, 7 }
   0xa   :  { %25 = vadd.xlane.f32.xlu0 %v24_v19  ;;  %v63_v25 = vsel %vm62_vm4, %v61_v23, %v50_v18  ;;  %v75_v26 = vsub.f32 %v13_v2, %v73_v21  ;;  %v77_v27 = vsub.f32 %v13_v2, %v36_v6  ;;  %v56_v28 = vrot.slane %v41_v9, 6 }
   0xb   :  { %v54_v29 = vrot.slane %v41_v9, 5  ;;  %v65_v30 = vsel %vm64_vm5, %v63_v25, %v38_v10  ;;  %v80_v31 = vsub.f32 %v13_v2, %v78_v24  ;;  %v87_v32 = vrot.slane %v76_v17, 6 }
   0xc   :  { %v67_v33 = vsel %vm66_vm6, %v65_v30, %v43_v13  ;;  %v82_v34 = vrot.slane %v75_v26, 4  ;;  %v84_v35 = vrot.slane %v75_v26, 1  ;;  %v89_v36 = vrot.slane %v75_v26, 2 }
   0xd   :  { %v69_v37 = vsel %vm68_vm7, %v67_v33, %v52_v22  ;;  %vm70_vm8 = vcmask 1046528   ;;  %v91_v38 = vrot.slane %v75_v26, 7  ;;  %v94_v39 = vrot.slane %v77_v27, 4 }
   0xe   :  { %v103_v40 = vsel %vm58_vm2, %v82_v34, %v84_v35  ;;  %v101_v41 = vrot.slane %v80_v31, 5  ;;  %v111_v42 = vmul.f32 %v56_v28, %v56_v28  ;;  %v97_v43 = vrot.slane %v80_v31, 3 }
   0xf   :  { %v104_v44 = vsel %vm60_vm3, %v103_v40, %v87_v32  ;;  %v71_v45 = vsel %vm70_vm8, %v69_v37, %v54_v29  ;;  %v99_v46 = vrot.slane %v80_v31, 4  ;;  %vm125_vm9 = vcmask 8192  }
  0x10   :  { %v105_v47 = vsel %vm62_vm4, %v104_v44, %v89_v36  ;;  %v113_v48 = vmul.f32 %v101_v41, %v101_v41  ;;  %v110_v53 = vmul.f32 %v71_v45, %v71_v45 }
  0x11   :  { %v106_v49 = vsel %vm64_vm5, %v105_v47, %v91_v38 }
  0x12   :  { %v107_v50 = vsel %vm66_vm6, %v106_v49, %v94_v39  ;;  %v115_v51 = vadd.f32 %v113_v48, %v111_v42 }
  0x13   :  { %v108_v52 = vsel %vm68_vm7, %v107_v50, %v97_v43 }
  0x14   :  { %v109_v54 = vsel %vm70_vm8, %v108_v52, %v99_v46  ;;  %v117_v56 = vmax.f32 %v115_v51, 1e-24 }
  0x15   :  { %v112_v55 = vmul.f32 %v109_v54, %v109_v54 }
  0x16   :  { %254 = vrsqrt.f32 %v117_v56 }
  0x17   :  { %v114_v57 = vadd.f32 %v112_v55, %v110_v53 }
  0x19   :  { %v116_v58 = vmax.f32 %v114_v57, 1e-24 }
  0x1b   :  { %256 = vrsqrt.f32 %v116_v58 }
  0x20   :  { %v255_v59 = vpop.eup %254 }
  0x21   :  { %v121_v63 = vmul.f32 %v255_v59, %v56_v28  ;;  %v130_v0 = vmul.f32 %v255_v59, %v101_v41 }
  0x23   :  { %v126_v3 = vsel %vm125_vm9, %v121_v63, 0.0  ;;  %v134_v4 = vsel %vm125_vm9, %v130_v0, 0.0 }
  0x25   :  { %v257_v60 = vpop.eup %256 }
  0x26   :  { %v129_v61 = vmul.f32 %v257_v60, %v109_v54  ;;  %v120_v62 = vmul.f32 %v257_v60, %v71_v45 }
  0x28   :  { %v131_v1 = vsel %vm20_vm0, %v129_v61, 0.0  ;;  %v122_v2 = vsel %vm20_vm0, %v120_v62, 0.0 }
  0x29   :  { %132 = vadd.xlane.f32.xlu1 %v131_v1  ;;  %123 = vadd.xlane.f32.xlu0 %v122_v2 }
  0x2d   :  { %127 = vadd.xlane.f32.xlu1 %v126_v3  ;;  %135 = vadd.xlane.f32.xlu0 %v134_v4 }
  0x97   :  { %v26_v5 = vpop.xlane.xlu0 %25 }
  0x98   :  { %v27_v6 = vrot.slane %v26_v5, 4 }
  0x9a   :  { %v28_v7 = vadd.f32 %v27_v6, %v26_v5 }
  0x9c   :  { %v29_v8 = vrot.slane %v28_v7, 2 }
  0x9e   :  { %v30_v9 = vadd.f32 %v29_v8, %v28_v7 }
  0xa0   :  { %v31_v10 = vrot.slane %v30_v9, 1 }
  0xa2   :  { %v32_v11 = vadd.f32 %v31_v10, %v30_v9 }
  0xa4   :  { %215 = vpush %v32_v11 }
  0xb6   :  { %v133_v12 = vpop.xlane.xlu1 %132  ;;  %v124_v13 = vpop.xlane.xlu0 %123 }
  0xb7   :  { %v137_v14 = vrot.slane %v124_v13, 1  ;;  %v141_v15 = vrot.slane %v133_v12, 1  ;;  %v146_v16 = vrot.slane %v124_v13, 2  ;;  %v149_v17 = vrot.slane %v133_v12, 2 }
  0xb8   :  { %v154_v18 = vrot.slane %v124_v13, 3  ;;  %v156_v19 = vrot.slane %v124_v13, 4  ;;  %v159_v20 = vrot.slane %v133_v12, 3  ;;  %v161_v21 = vrot.slane %v133_v12, 4 }
  0xb9   :  { %217 = vpush %v137_v14  ;;  %v166_v22 = vrot.slane %v124_v13, 5  ;;  %v169_v23 = vrot.slane %v133_v12, 5  ;;  %v174_v24 = vrot.slane %v124_v13, 7  ;;  %v176_v25 = vrot.slane %v124_v13, 6 }
  0xba   :  { %219 = vpush %v124_v13  ;;  %v179_v26 = vrot.slane %v133_v12, 7  ;;  %v181_v27 = vrot.slane %v133_v12, 6  ;;  %v128_v28 = vpop.xlane.xlu1 %127  ;;  %v136_v29 = vpop.xlane.xlu0 %135 }
  0xbb   :  { %221 = vpush %v141_v15 }
  0xbc   :  { %223 = vpush %v133_v12 }
  0xbd   :  { %225 = vpush %v146_v16 }
  0xbe   :  { %227 = vpush %v149_v17 }
  0xbf   :  { %229 = vpush %v154_v18 }
  0xc0   :  { %231 = vpush %v156_v19 }
  0xc1   :  { %233 = vpush %v159_v20 }
  0xc2   :  { %235 = vpush %v161_v21 }
  0xc3   :  { %237 = vpush %v166_v22 }
  0xc4   :  { %239 = vpush %v169_v23 }
  0xc5   :  { %241 = vpush %v174_v24 }
  0xc6   :  { %243 = vpush %v176_v25 }
  0xc7   :  { %245 = vpush %v179_v26 }
  0xc8   :  { %247 = vpush %v181_v27 }
  0xc9   :  { %249 = vpush %v128_v28 }
  0xca   :  { %251 = vpush %v136_v29 }
  0xd5   :  { %s315_s0 = spop %215 }
  0xd6   :  { %s34_s1 = smul.f32 0.5, %s315_s0 }
  0xd8   :  { %196 = sst [smem:[#allocation2]] %s34_s1 }
  0xea   :  { %s218_s17 = spop %217 }
  0xeb   :  { %s220_s18 = spop %219 }
  0xec   :  { %s222_s19 = spop %221  ;;  %s140_s20 = smul.f32 %s220_s18, %s218_s17 }
  0xed   :  { %s224_s21 = spop %223 }
  0xee   :  { %s144_s22 = smul.f32 %s224_s21, %s222_s19  ;;  %s226_s23 = spop %225 }
  0xef   :  { %s148_s24 = smul.f32 %s226_s23, %s218_s17  ;;  %s228_s25 = spop %227 }
  0xf0   :  { %s151_s26 = smul.f32 %s228_s25, %s222_s19  ;;  %s230_s27 = spop %229 }
  0xf1   :  { %s145_s28 = sadd.f32 %s144_s22, %s140_s20  ;;  %s232_s29 = spop %231 }
  0xf2   :  { %s152_s30 = sadd.f32 %s151_s26, %s148_s24  ;;  %s234_s3 = spop %233 }
  0xf3   :  { %s158_s4 = smul.f32 %s232_s29, %s230_s27  ;;  %s236_s5 = spop %235 }
  0xf4   :  { %s163_s6 = smul.f32 %s236_s5, %s234_s3  ;;  %s238_s7 = spop %237 }
  0xf5   :  { %s240_s8 = spop %239  ;;  %s153_s9 = sadd.f32 %s152_s30, %s145_s28 }
  0xf6   :  { %s168_s10 = smul.f32 %s238_s7, %s232_s29  ;;  %s242_s11 = spop %241 }
  0xf7   :  { %s164_s12 = sadd.f32 %s163_s6, %s158_s4  ;;  %s244_s13 = spop %243 }
  0xf8   :  { %s171_s14 = smul.f32 %s240_s8, %s236_s5  ;;  %s246_s16 = spop %245 }
  0xf9   :  { %s165_s15 = sadd.f32 %s164_s12, %s153_s9  ;;  %s178_s17 = smul.f32 %s244_s13, %s242_s11 }
  0xfa   :  { %s248_s18 = spop %247  ;;  %s172_s21 = sadd.f32 %s171_s14, %s168_s10 }
  0xfb   :  { %s183_s19 = smul.f32 %s248_s18, %s246_s16  ;;  %s250_s20 = spop %249 }
  0xfc   :  { %s252_s22 = spop %251  ;;  %s186_s23 = smul.f32 %s250_s20, %s242_s11 }
  0xfd   :  { %s173_s24 = sadd.f32 %s172_s21, %s165_s15  ;;  %s188_s25 = smul.f32 %s252_s22, %s246_s16 }
  0xfe   :  { %s184_s26 = sadd.f32 %s183_s19, %s178_s17  ;;  %s258_s8 = scalar_lea.hbm %s336_s2, 16 }
  0xff   :  { %s189_s27 = sadd.f32 %s188_s25, %s186_s23  ;;  %s193_s29 = smul.f32 0.003125, %s173_s24 }
 0x100   :  { %p259_p0 = scmp.ne.s32.totalorder %s336_s2, %s258_s8  ;;  %p262_p1 = scmp.lt.u32.totalorder %s258_s8, %s336_s2 }
 0x101   :  { %s190_s28 = sadd.f32 %s189_s27, %s184_s26 }
 0x102   :  { %p264_p2 = pnand %p262_p1, %p259_p0 }
 0x103   :  { %s191_s30 = smul.f32 0.00625, %s190_s28 }
 0x105   :  { %s192_s3 = ssub.f32 0.1, %s191_s30 }
 0x107   :  { %s194_s4 = ssub.f32 %s192_s3, %s193_s29 }
 0x109   :  { %198 = sst [smem:[#allocation2 + $0x1]] %s194_s4 }
 0x10a   :  { %s199_s5 = sadd.f32 %s194_s4, %s34_s1 }
 0x10c   :  { %201 = sst [smem:[#allocation2 + $0x2]] %s199_s5 }
 0x10d   :  { %267 = shalt.err (!%p264_p2)
}
 0x10e   :  { %s270_s13 = smov [#allocation2]  }
 0x10f   :  { %209 = dma.smem_to_hbm %s270_s13, 16, %s336_s2, [#allocation3]  }
 0x110   :  { %268 = dma.done.wait [#allocation3], 16  }
 0x111   :  { %269 = vsyncadd [#allocation3], 4294967280 }
 0x112   :  { %213 = sfence }
 0x113   :  { %214 = vsyncpa [#allocation3], 1 }

</bundles_post_ra>
